<compile_context>
chip_gen: v6e
topology: v6e:2x2x1
jax: 0.10.0
libtpu: 0.0.40
codegen_flags: <defaults>
</compile_context>

<pallas_src>
import functools

import jax
import jax.numpy as jnp
from jax import lax
from jax.experimental import pallas as pl
from jax.experimental.pallas import tpu as pltpu


def _multi_sym_loss_kernel(grid_ref, sym_ref, out_ref, s_ref, *,
                           Cs, weights, TB, unroll):
    """grid_ref: (TB, 2, H, TW) VMEM; sym_ref: (TB, 2, 1, TW) VMEM;
    out_ref: (1, 1) SMEM; s_ref: (H, TW) f32 VMEM scratch."""
    H = grid_ref.shape[2]
    TW = grid_ref.shape[3]

    def body(t, acc):
        # Per-lane multipliers for this (packed) batch, shape (1, TW).
        m0 = sym_ref[t, 0]          # multiplies channel 0 (== sym_y per lane)
        m1 = sym_ref[t, 1]          # multiplies channel 1 (== sym_x per lane)
        # s = x*sym_y + y*sym_x computed ONCE per batch tile (perf feedback):
        # each C term below becomes one shifted subtract + square-accumulate.
        s_ref[...] = grid_ref[t, 0] * m0 + grid_ref[t, 1] * m1
        for C, w in zip(Cs, weights):        # static, unrolled (few C values)
            # Shifted windows are read straight from the VMEM scratch ref, so
            # the C-row offset is absorbed into the load (no value relayout).
            # TODO(synk): for C % 8 != 0 these are sublane-misaligned loads; a
            # pltpu.roll-based variant is only worth it if vld saturates.
            val = (s_ref[pl.ds(0, H - C), :] - s_ref[pl.ds(C, H - C), :])
            # Deferred reduction: lane-wide accumulator; the cross-lane reduce
            # happens once per block, not per (t, C).
            acc = acc + jnp.float32(w) * jnp.sum(val * val, axis=0,
                                                 keepdims=True)
        return acc

    acc0 = jnp.zeros((1, TW), jnp.float32)
    if TB == 1:
        acc = body(0, acc0)                        # static index, no loop
    else:
        acc = lax.fori_loop(0, TB, body, acc0, unroll=unroll)
    out_ref[0, 0] = jnp.sum(acc)                   # single cross-lane reduce


def _lane_pack_factor(B, W):
    """How many batches to fold into the lane axis (target ~128 lanes)."""
    if W >= 128 or B <= 1:
        return 1
    g = max(1, min(B, 128 // W))
    while B % g:
        g -= 1
    return g


def _vmem_budget():
    """(vmem_limit_bytes, per-block input budget) — generation aware."""
    try:
        vmem_cap = int(pltpu.get_tpu_info().vmem_capacity_bytes)
    except Exception:
        vmem_cap = 64 << 20                        # conservative (v7x-sized)
    vmem_limit = min(vmem_cap * 3 // 4, 100 << 20)  # headroom below physical
    # 2x double-buffered input block + s scratch + slack must fit the limit.
    return vmem_limit, vmem_limit // 3


def _pick_tiles(Bp, H, Wp, budget_bytes):
    """(TB, TW): packed batches per block and lane-tile width."""
    per_batch = 2 * H * Wp * 4
    if per_batch <= budget_bytes:
        tb = max(1, min(Bp, budget_bytes // per_batch))
        if Bp >= 2:
            # Keep >= 2 grid steps: v7x has 2 TensorCores, and >= 2 steps also
            # enables DMA/compute double-buffer overlap everywhere.
            tb = min(tb, max(1, Bp // 2))
        while Bp % tb:
            tb -= 1
        return tb, Wp
    # Single packed batch exceeds the budget: tile W (no halo needed along W).
    if Wp % 128 == 0:
        tw = 128
        for cand in range(Wp, 127, -128):
            if Wp % cand == 0 and 2 * H * cand * 4 <= budget_bytes:
                tw = cand
                break
        # TODO(synk): if even 2*H*128*4 exceeds the budget (huge H), tile H
        # with a max(Cs)-row halo instead of over-budgeting VMEM.
        return 1, tw
    # TODO(synk): Wp not a multiple of 128 with a single batch over budget:
    # fall back to whole-row blocks (may exceed the soft VMEM budget).
    return 1, Wp


def multi_sym_loss(grid, sym_axis, C_start, C_step, C_end):
    """grid: (B, 2, H, W), sym_axis: (B, 2) -> scalar f32."""
    Cs = tuple(range(C_start, C_end + 1, C_step))
    B, ch, H, W = grid.shape
    assert ch == 2, "grid must have 2 channels (x, y)"
    assert all(0 < C < H for C in Cs), "every C must satisfy 0 < C < H"

    grid = grid.astype(jnp.float32)
    sym_axis = sym_axis.astype(jnp.float32)

    # Lane-dense packing: fold g batches into the lane axis when W < 128.
    g = _lane_pack_factor(B, W)
    Bp, Wp = B // g, g * W
    if g > 1:
        grid_p = (grid.reshape(Bp, g, 2, H, W)
                      .transpose(0, 2, 3, 1, 4)
                      .reshape(Bp, 2, H, Wp))
    else:
        grid_p = grid

    # Per-lane multipliers: grid channel 0 is scaled by sym_y, channel 1 by
    # sym_x.  Shape (Bp, 2, 1, Wp) so the kernel broadcasts over H.
    m0 = jnp.repeat(sym_axis[:, 1].reshape(Bp, g), W, axis=1)   # sym_y lanes
    m1 = jnp.repeat(sym_axis[:, 0].reshape(Bp, g), W, axis=1)   # sym_x lanes
    sym_mult = jnp.stack([m0, m1], axis=1).reshape(Bp, 2, 1, Wp)

    vmem_limit, budget = _vmem_budget()
    TB, TW = _pick_tiles(Bp, H, Wp, budget)
    nb, nw = Bp // TB, Wp // TW

    # Fold the per-C normalization 1/((H-C)*W*B) into compile-time weights.
    weights = tuple(1.0 / ((H - C) * W * B) for C in Cs)

    n_rows = sum(H - C for C in Cs)
    cost = pl.CostEstimate(
        flops=Bp * Wp * (3 * H + 3 * n_rows),
        transcendentals=0,
        bytes_accessed=Bp * 2 * H * Wp * 4 + Bp * 2 * Wp * 4 + nb * nw * 4,
    )

    partials = pl.pallas_call(
        functools.partial(_multi_sym_loss_kernel, Cs=Cs, weights=weights,
                          TB=TB, unroll=max(1, min(TB, 4))),
        out_shape=jax.ShapeDtypeStruct((nb, nw), jnp.float32),
        grid_spec=pltpu.PrefetchScalarGridSpec(
            num_scalar_prefetch=0,
            grid=(nb, nw),
            in_specs=[
                pl.BlockSpec((TB, 2, H, TW), lambda i, j: (i, 0, 0, j)),
                pl.BlockSpec((TB, 2, 1, TW), lambda i, j: (i, 0, 0, j)),
            ],
            out_specs=pl.BlockSpec((1, 1), lambda i, j: (i, j),
                                   memory_space=pltpu.SMEM),
            scratch_shapes=[pltpu.VMEM((H, TW), jnp.float32)],
        ),
        compiler_params=pltpu.CompilerParams(
            dimension_semantics=("parallel", "parallel"),
            vmem_limit_bytes=vmem_limit),
        cost_estimate=cost,
    )(grid_p, sym_mult)

    # Glue: sum per-block partials (per-C normalizers already folded in).
    return jnp.sum(partials)


def _multi_sym_loss_ref(grid, sym_axis, C_start, C_step, C_end):
    B, _, H, W = grid.shape
    sym_x = sym_axis[:, 0].reshape(B, 1, 1)
    sym_y = sym_axis[:, 1].reshape(B, 1, 1)
    total = jnp.float32(0.0)
    for C in range(C_start, C_end + 1, C_step):
        dx = grid[:, 0, : H - C, :] - grid[:, 0, C:, :]
        dy = grid[:, 1, : H - C, :] - grid[:, 1, C:, :]
        total += jnp.sum((dx * sym_y + dy * sym_x) ** 2) / ((H - C) * W * B)
    return total


if __name__ == "__main__":
    # MultiSymLoss(C_start=1, C_step=1, C_end=3) -> C list [1, 2, 3]
    C_start, C_step, C_end = 1, 1, 3
    key = jax.random.PRNGKey(0)
    k1, k2, k3, k4 = jax.random.split(key, 4)

    # Small canonical shape (single-block, lane-packed path).
    B, H, W = 2, 16, 16
    grid_in = jax.random.normal(k1, (B, 2, H, W), dtype=jnp.float32)
    sym_axis = jax.random.normal(k2, (B, 2), dtype=jnp.float32)
    loss = jax.block_until_ready(
        multi_sym_loss(grid_in, sym_axis, C_start, C_step, C_end))
    ref = jax.block_until_ready(
        _multi_sym_loss_ref(grid_in, sym_axis, C_start, C_step, C_end))
    assert jnp.allclose(loss, ref, rtol=1e-5, atol=1e-6), (loss, ref)

    # Larger batch: exercises the fori_loop (TB > 1) and multi-step grid path.
    B2 = 32
    grid_in2 = jax.random.normal(k3, (B2, 2, H, W), dtype=jnp.float32)
    sym_axis2 = jax.random.normal(k4, (B2, 2), dtype=jnp.float32)
    loss2 = jax.block_until_ready(
        multi_sym_loss(grid_in2, sym_axis2, C_start, C_step, C_end))
    ref2 = jax.block_until_ready(
        _multi_sym_loss_ref(grid_in2, sym_axis2, C_start, C_step, C_end))
    assert jnp.allclose(loss2, ref2, rtol=1e-5, atol=1e-6), (loss2, ref2)

    print("KERNEL_OK")
</pallas_src>

<mosaic_0001>
module attributes {stable_mosaic.version = 11 : i64} {
  func.func @_multi_sym_loss_kernel(%arg0: i32, %arg1: i32, %arg2: memref<1x2x16x32xf32, #tpu.memory_space<vmem>>, %arg3: memref<1x2x1x32xf32, #tpu.memory_space<vmem>>, %arg4: memref<1x1xf32, #tpu.memory_space<smem>>, %arg5: memref<16x32xf32, #tpu.memory_space<vmem>>) attributes {dimension_semantics = [#tpu.dimension_semantics<parallel>, #tpu.dimension_semantics<parallel>], iteration_bounds = array<i64: 1, 1>, scalar_prefetch = 0 : i64, scratch_operands = 1 : i64, tpu.core_type = #tpu.core_type<tc>, window_params = [{transform_indices = @transform_0, window_bounds = array<i64: 1, 2, 16, 32>}, {transform_indices = @transform_1, window_bounds = array<i64: 1, 2, 1, 32>}, {transform_indices = @transform_2, window_bounds = array<i64: 1, 1>}]} {
    %cst = arith.constant 0.000000e+00 : f32
    %0 = vector.broadcast %cst : f32 to vector<1x32xf32>
    %c0 = arith.constant 0 : index
    %c0_0 = arith.constant 0 : index
    %c0_1 = arith.constant 0 : index
    %c0_2 = arith.constant 0 : index
    %1 = vector.load %arg3[%c0, %c0_0, %c0_1, %c0_2] : memref<1x2x1x32xf32, #tpu.memory_space<vmem>>, vector<1x1x1x32xf32>
    %2 = vector.shape_cast %1 : vector<1x1x1x32xf32> to vector<1x32xf32>
    %c0_3 = arith.constant 0 : index
    %c1 = arith.constant 1 : index
    %c0_4 = arith.constant 0 : index
    %c0_5 = arith.constant 0 : index
    %3 = vector.load %arg3[%c0_3, %c1, %c0_4, %c0_5] : memref<1x2x1x32xf32, #tpu.memory_space<vmem>>, vector<1x1x1x32xf32>
    %4 = vector.shape_cast %3 : vector<1x1x1x32xf32> to vector<1x32xf32>
    %c0_6 = arith.constant 0 : index
    %c0_7 = arith.constant 0 : index
    %c0_8 = arith.constant 0 : index
    %c0_9 = arith.constant 0 : index
    %5 = vector.load %arg2[%c0_6, %c0_7, %c0_8, %c0_9] : memref<1x2x16x32xf32, #tpu.memory_space<vmem>>, vector<1x1x16x32xf32>
    %6 = vector.shape_cast %5 : vector<1x1x16x32xf32> to vector<16x32xf32>
    %7 = vector.broadcast %2 : vector<1x32xf32> to vector<16x32xf32>
    %8 = arith.mulf %6, %7 : vector<16x32xf32>
    %c0_10 = arith.constant 0 : index
    %c1_11 = arith.constant 1 : index
    %c0_12 = arith.constant 0 : index
    %c0_13 = arith.constant 0 : index
    %9 = vector.load %arg2[%c0_10, %c1_11, %c0_12, %c0_13] : memref<1x2x16x32xf32, #tpu.memory_space<vmem>>, vector<1x1x16x32xf32>
    %10 = vector.shape_cast %9 : vector<1x1x16x32xf32> to vector<16x32xf32>
    %11 = vector.broadcast %4 : vector<1x32xf32> to vector<16x32xf32>
    %12 = arith.mulf %10, %11 : vector<16x32xf32>
    %13 = arith.addf %8, %12 : vector<16x32xf32>
    %c0_14 = arith.constant 0 : index
    %c0_15 = arith.constant 0 : index
    %14 = vector.load %arg5[%c0_14, %c0_15] : memref<16x32xf32, #tpu.memory_space<vmem>>, vector<16x32xf32>
    tpu.vector_store %arg5[%c0_14, %c0_15], %13 {strides = array<i32>} : memref<16x32xf32, #tpu.memory_space<vmem>>, vector<16x32xf32>,
    %c0_16 = arith.constant 0 : index
    %c0_17 = arith.constant 0 : index
    %15 = vector.load %arg5[%c0_16, %c0_17] : memref<16x32xf32, #tpu.memory_space<vmem>>, vector<15x32xf32>
    %c1_18 = arith.constant 1 : index
    %c0_19 = arith.constant 0 : index
    %16 = vector.load %arg5[%c1_18, %c0_19] : memref<16x32xf32, #tpu.memory_space<vmem>>, vector<15x32xf32>
    %17 = arith.subf %15, %16 : vector<15x32xf32>
    %18 = arith.mulf %17, %17 : vector<15x32xf32>
    %cst_20 = arith.constant dense<0.000000e+00> : vector<32xf32>
    %19 = vector.multi_reduction <add>, %18, %cst_20 [0] : vector<15x32xf32> to vector<32xf32>
    %20 = vector.shape_cast %19 : vector<32xf32> to vector<1x32xf32>
    %cst_21 = arith.constant 0.00208333344 : f32
    %21 = vector.broadcast %cst_21 : f32 to vector<1x32xf32>
    %22 = arith.mulf %21, %20 : vector<1x32xf32>
    %23 = arith.addf %0, %22 : vector<1x32xf32>
    %c0_22 = arith.constant 0 : index
    %c0_23 = arith.constant 0 : index
    %24 = vector.load %arg5[%c0_22, %c0_23] : memref<16x32xf32, #tpu.memory_space<vmem>>, vector<14x32xf32>
    %c2 = arith.constant 2 : index
    %c0_24 = arith.constant 0 : index
    %25 = vector.load %arg5[%c2, %c0_24] : memref<16x32xf32, #tpu.memory_space<vmem>>, vector<14x32xf32>
    %26 = arith.subf %24, %25 : vector<14x32xf32>
    %27 = arith.mulf %26, %26 : vector<14x32xf32>
    %cst_25 = arith.constant dense<0.000000e+00> : vector<32xf32>
    %28 = vector.multi_reduction <add>, %27, %cst_25 [0] : vector<14x32xf32> to vector<32xf32>
    %29 = vector.shape_cast %28 : vector<32xf32> to vector<1x32xf32>
    %cst_26 = arith.constant 0.00223214296 : f32
    %30 = vector.broadcast %cst_26 : f32 to vector<1x32xf32>
    %31 = arith.mulf %30, %29 : vector<1x32xf32>
    %32 = arith.addf %23, %31 : vector<1x32xf32>
    %c0_27 = arith.constant 0 : index
    %c0_28 = arith.constant 0 : index
    %33 = vector.load %arg5[%c0_27, %c0_28] : memref<16x32xf32, #tpu.memory_space<vmem>>, vector<13x32xf32>
    %c3 = arith.constant 3 : index
    %c0_29 = arith.constant 0 : index
    %34 = vector.load %arg5[%c3, %c0_29] : memref<16x32xf32, #tpu.memory_space<vmem>>, vector<13x32xf32>
    %35 = arith.subf %33, %34 : vector<13x32xf32>
    %36 = arith.mulf %35, %35 : vector<13x32xf32>
    %cst_30 = arith.constant dense<0.000000e+00> : vector<32xf32>
    %37 = vector.multi_reduction <add>, %36, %cst_30 [0] : vector<13x32xf32> to vector<32xf32>
    %38 = vector.shape_cast %37 : vector<32xf32> to vector<1x32xf32>
    %cst_31 = arith.constant 0.00240384624 : f32
    %39 = vector.broadcast %cst_31 : f32 to vector<1x32xf32>
    %40 = arith.mulf %39, %38 : vector<1x32xf32>
    %41 = arith.addf %32, %40 : vector<1x32xf32>
    %42 = vector.shape_cast %41 : vector<1x32xf32> to vector<1x1x32xf32>
    %cst_32 = arith.constant dense<0.000000e+00> : vector<1xf32>
    %43 = vector.multi_reduction <add>, %42, %cst_32 [1, 2] : vector<1x1x32xf32> to vector<1xf32>
    %44 = vector.shape_cast %43 : vector<1xf32> to vector<1x1x1xf32>
    %45 = vector.extract %44[0, 0, 0] : f32 from vector<1x1x1xf32>
    %c0_33 = arith.constant 0 : index
    %c0_34 = arith.constant 0 : index
    %46 = memref.load %arg4[%c0_33, %c0_34] : memref<1x1xf32, #tpu.memory_space<smem>>
    memref.store %45, %arg4[%c0_33, %c0_34] : memref<1x1xf32, #tpu.memory_space<smem>>
    return
  }
  func.func @transform_0(%arg0: i32, %arg1: i32) -> (i32, i32, i32, i32) {
    %c0_i32 = arith.constant 0 : i32
    %c0_i32_0 = arith.constant 0 : i32
    %c0_i32_1 = arith.constant 0 : i32
    return %arg0, %c0_i32, %c0_i32_0, %arg1 : i32, i32, i32, i32
  }
  func.func @transform_1(%arg0: i32, %arg1: i32) -> (i32, i32, i32, i32) {
    %c0_i32 = arith.constant 0 : i32
    %c0_i32_0 = arith.constant 0 : i32
    %c0_i32_1 = arith.constant 0 : i32
    return %arg0, %c0_i32, %c0_i32_0, %arg1 : i32, i32, i32, i32
  }
  func.func @transform_2(%arg0: i32, %arg1: i32) -> (i32, i32) {
    %c0_i32 = arith.constant 0 : i32
    return %arg0, %arg1 : i32, i32
  }
}

</mosaic_0001>

<bundles_post_ra>
// kernel: tpu_custom_call.1
= control target key start
LH: loop header
LB: loop body
LE: loop exit
PB: predicated region body
PF: predicated region fallthrough
CT: control target
= control target key end

     0   :  { %7 = vsyncpa [#allocation4], 0  ;;  %s256_s0 = inlined_call_operand.hbm [shape: f32[1,2,16,32], index: 0, kind: input, shape index: {}]   ;;  %s257_s1 = inlined_call_operand.hbm [shape: f32[1,2,1,32], index: 1, kind: input, shape index: {}]   ;;  %s258_s2 = inlined_call_operand.hbm [shape: f32[1,1], index: 2, kind: output, shape index: {}]  }
   0x1   :  { %8 = vsyncpa [#allocation7], 0 }
   0x2   :  { %9 = vsyncpa [#allocation5], 0  ;;  %s220_s9 = smov [#allocation3]  }
   0x3   :  { %s15_s10 = sshll.u32 %s220_s9, 4  ;;  %s16_s10 = int_to_ptr.vmem [resolvable:$true] %s15_s10 }
   0x4   :  { %s174_s11 = scalar_lea.vmem %s16_s10, 512  ;;  %p179_p1 = scmp.lt.s32.totalorder %s16_s10, %s16_s10 }
   0x5   :  { %p175_p0 = scmp.ne.s32.totalorder %s16_s10, %s174_s11  ;;  %p180_p2 = scmp.lt.s32.totalorder %s174_s11, %s174_s11 }
   0x7   :  { %p181_p3 = por %p180_p2, %p179_p1 }
   0x9   :  { %p182_p4 = pnand %p181_p3, %p175_p0 }
   0xb   :  { %185 = shalt.err (!%p182_p4)
}
   0xc   :  { %s221_s12 = smov 128   ;;  %s222_s13 = smov 8  }
   0xd   :  { %21 = dma.hbm_to_vmem [thread:$0]  %s256_s0, 512, %s16_s10, [#allocation4], %s221_s12, %s221_s12, %s222_s13  }
   0xe   :  { %s223_s16 = smov [#allocation6]  }
   0xf   :  { %s27_s17 = sshll.u32 %s223_s16, 4  ;;  %s28_s17 = int_to_ptr.vmem [resolvable:$true] %s27_s17 }
  0x10   :  { %s194_s18 = scalar_lea.vmem %s28_s17, 32  ;;  %p199_p6 = scmp.lt.s32.totalorder %s28_s17, %s28_s17 }
  0x11   :  { %p195_p5 = scmp.ne.s32.totalorder %s28_s17, %s194_s18  ;;  %p200_p7 = scmp.lt.s32.totalorder %s194_s18, %s194_s18 }
  0x13   :  { %p201_p8 = por %p200_p7, %p199_p6 }
  0x15   :  { %p202_p9 = pnand %p201_p8, %p195_p5 }
  0x17   :  { %205 = shalt.err (!%p202_p9)
}
  0x18   :  { %s224_s19 = smov 16   ;;  %s225_s20 = smov 1  }
  0x19   :  { %33 = dma.hbm_to_vmem [thread:$0]  %s257_s1, 32, %s28_s17, [#allocation7], %s224_s19, %s224_s19, %s225_s20  }
  0x1a   :  { %214 = dma.done.wait [#allocation4], 512  }
  0x1b   :  { %215 = vsyncadd [#allocation4], 4294966784 }
  0x1c   :  { %216 = dma.done.wait [#allocation7], 32  }
  0x1d   :  { %217 = vsyncadd [#allocation7], 4294967264  ;;  %v155_v0 = vld [vmem:[#allocation6] ss:$0 sm:$0xff]  ;;  %v156_v1 = vld [vmem:[#allocation6 + $0x1] ss:$0 sm:$0xff] }
  0x1e   :  { %v43_v2 = vld [vmem:[#allocation3] sm:$0xff]  ;;  %v44_v3 = vld [vmem:[#allocation3 + $0x8] sm:$0xff]  ;;  %v54_v5 = vld [vmem:[#allocation3 + $0x10] sm:$0xff]  ;;  %vm66_vm0 = vcmask 261120   ;;  %vm78_vm1 = vcmask 260096   ;;  %vm97_vm2 = vcmask 259072  }
  0x1f   :  { %v51_v4 = vmul.f32 %v155_v0, %v43_v2  ;;  %v55_v6 = vld [vmem:[#allocation3 + $0x18] sm:$0xff]  ;;  %v52_v7 = vmul.f32 %v155_v0, %v44_v3  ;;  %v62_v8 = vmul.f32 %v156_v1, %v54_v5  ;;  %vm116_vm3 = vcmask 258048   ;;  %s226_s1 = smov [#allocation8]  }
  0x20   :  { %v63_v9 = vmul.f32 %v156_v1, %v55_v6  ;;  %vm127_vm4 = vcmask 253952  }
  0x21   :  { %v64_v10 = vadd.f32 %v62_v8, %v51_v4 }
  0x22   :  { %v65_v11 = vadd.f32 %v63_v9, %v52_v7 }
  0x23   :  { %67 = vst.msk [vmem:[#allocation2] sm:$0xff] %vm66_vm0, %v64_v10 }
  0x24   :  { %68 = vst.msk [vmem:[#allocation2 + $0x8] sm:$0xff] %vm66_vm0, %v65_v11 }
  0x2a   :  { %v69_v12 = vld [vmem:[#allocation2] sm:$0xff] }
  0x2b   :  { %v70_v13 = vld [vmem:[#allocation2 + $0x8] sm:$0x7f] }
  0x2c   :  { %v71_v14 = vld [vmem:[#allocation2 + $0x1] sm:$0xff]  ;;  %v72_v15 = vld [vmem:[#allocation2 + $0x9] sm:$0x7f] }
  0x2d   :  { %v73_v16 = vsub.f32 %v69_v12, %v71_v14  ;;  %v89_v17 = vld [vmem:[#allocation2 + $0x8] sm:$0x3f]  ;;  %v74_v19 = vsub.f32 %v70_v13, %v72_v15 }
  0x2e   :  { %v90_v18 = vld [vmem:[#allocation2 + $0x2] sm:$0xff]  ;;  %v91_v20 = vld [vmem:[#allocation2 + $0xa] sm:$0x3f] }
  0x2f   :  { %v92_v21 = vsub.f32 %v69_v12, %v90_v18  ;;  %v108_v22 = vld [vmem:[#allocation2 + $0x8] sm:$0x1f]  ;;  %v75_v24 = vmul.f32 %v73_v16, %v73_v16  ;;  %v93_v25 = vsub.f32 %v89_v17, %v91_v20  ;;  %v76_v28 = vmul.f32 %v74_v19, %v74_v19 }
  0x30   :  { %v109_v23 = vld [vmem:[#allocation2 + $0x3] sm:$0xff]  ;;  %v110_v26 = vld [vmem:[#allocation2 + $0xb] sm:$0x1f] }
  0x31   :  { %v111_v27 = vsub.f32 %v69_v12, %v109_v23  ;;  %v94_v29 = vmul.f32 %v92_v21, %v92_v21  ;;  %v112_v30 = vsub.f32 %v108_v22, %v110_v26  ;;  %v77_v31 = vsel %vm66_vm0, %v75_v24, 0.0 }
  0x32   :  { %v95_v32 = vmul.f32 %v93_v25, %v93_v25  ;;  %v79_v34 = vsel %vm78_vm1, %v76_v28, 0.0 }
  0x33   :  { %v113_v33 = vmul.f32 %v111_v27, %v111_v27  ;;  %v96_v35 = vsel %vm66_vm0, %v94_v29, 0.0  ;;  %v114_v36 = vmul.f32 %v112_v30, %v112_v30  ;;  %v80_v37 = vadd.f32 %v79_v34, %v77_v31 }
  0x34   :  { %v98_v38 = vsel %vm97_vm2, %v95_v32, 0.0 }
  0x35   :  { %v115_v39 = vsel %vm66_vm0, %v113_v33, 0.0  ;;  %v99_v40 = vadd.f32 %v98_v38, %v96_v35  ;;  %v117_v41 = vsel %vm116_vm3, %v114_v36, 0.0  ;;  %v81_v42 = vrot.slane %v80_v37, 4 }
  0x36   :  { %v118_v43 = vadd.f32 %v117_v41, %v115_v39 }
  0x37   :  { %v100_v44 = vrot.slane %v99_v40, 4  ;;  %v82_v45 = vadd.f32 %v81_v42, %v80_v37 }
  0x38   :  { %v119_v46 = vrot.slane %v118_v43, 4 }
  0x39   :  { %v101_v47 = vadd.f32 %v100_v44, %v99_v40  ;;  %v83_v48 = vrot.slane %v82_v45, 2 }
  0x3a   :  { %v120_v49 = vadd.f32 %v119_v46, %v118_v43 }
  0x3b   :  { %v102_v50 = vrot.slane %v101_v47, 2  ;;  %v84_v51 = vadd.f32 %v83_v48, %v82_v45 }
  0x3c   :  { %v121_v52 = vrot.slane %v120_v49, 2 }
  0x3d   :  { %v103_v53 = vadd.f32 %v102_v50, %v101_v47  ;;  %v85_v54 = vrot.slane %v84_v51, 1 }
  0x3e   :  { %v122_v55 = vadd.f32 %v121_v52, %v120_v49 }
  0x3f   :  { %v104_v56 = vrot.slane %v103_v53, 1  ;;  %v86_v57 = vadd.f32 %v85_v54, %v84_v51 }
  0x40   :  { %v123_v58 = vrot.slane %v122_v55, 1 }
  0x41   :  { %v105_v59 = vadd.f32 %v104_v56, %v103_v53  ;;  %v87_v60 = vmul.f32 0.0020833334, %v86_v57 }
  0x42   :  { %v124_v61 = vadd.f32 %v123_v58, %v122_v55 }
  0x43   :  { %v106_v62 = vmul.f32 0.002232143, %v105_v59 }
  0x44   :  { %v125_v63 = vmul.f32 0.0024038462, %v124_v61 }
  0x45   :  { %v107_v0 = vadd.f32 %v106_v62, %v87_v60 }
  0x47   :  { %v126_v1 = vadd.f32 %v125_v63, %v107_v0 }
  0x49   :  { %v128_v2 = vsel %vm127_vm4, %v126_v1, 0.0 }
  0x4a   :  { %129 = vadd.xlane.f32.xlu0 %v128_v2 }
  0xd3   :  { %v130_v3 = vpop.xlane.xlu0 %129 }
  0xd4   :  { %v131_v4 = vrot.slane %v130_v3, 4 }
  0xd6   :  { %v132_v5 = vadd.f32 %v131_v4, %v130_v3 }
  0xd8   :  { %v133_v6 = vrot.slane %v132_v5, 2 }
  0xda   :  { %v134_v7 = vadd.f32 %v133_v6, %v132_v5 }
  0xdc   :  { %v135_v8 = vrot.slane %v134_v7, 1 }
  0xde   :  { %v136_v9 = vadd.f32 %v135_v8, %v134_v7 }
  0xe0   :  { %157 = vpush %v136_v9 }
 0x111   :  { %s158_s0 = spop %157 }
 0x112   :  { %139 = sst [smem:[#allocation8]] %s158_s0 }
 0x113   :  { %147 = dma.smem_to_hbm %s226_s1, 16, %s258_s2, [#allocation5]  }
 0x114   :  { %218 = dma.done.wait [#allocation5], 16  }
 0x115   :  { %219 = vsyncadd [#allocation5], 4294967280 }
 0x116   :  { %151 = sfence }
 0x117   :  { %152 = vsyncpa [#allocation4], 1 }
 0x118   :  { %153 = vsyncpa [#allocation7], 1 }
 0x119   :  { %154 = vsyncpa [#allocation5], 1 }

</bundles_post_ra>
